<compile_context>
chip_gen: v7x
topology: tpu7x:2x2x1
jax: 0.10.0
libtpu: 0.0.40
codegen_flags: <defaults>
</compile_context>

<pallas_src>
import functools

import jax
import jax.numpy as jnp
from jax import lax
from jax.experimental import pallas as pl
from jax.experimental.pallas import tpu as pltpu


def _self_attention_kernel(x_ref, wqkv_ref, wo2_ref, bias_ref, o_ref, *,
                           heads, head_dim, seq, dim, batch_block):
    H, hd, S, D, B = heads, head_dim, seq, dim, batch_block

    # Fused Q/K/V projection for the whole batch block: (B*S, D) x (D, 3D).
    # The (B, S, D) -> (B*S, D) merge only touches leading dims (free).
    x2 = x_ref[...].reshape(B * S, D)
    qkv = jnp.dot(x2, wqkv_ref[...], preferred_element_type=jnp.float32)   # (B*S, 3D)

    # One XLU transpose for the entire block; all per-(b, d) accesses below are
    # static sublane/lane slices of this single value (no gathers, no one-hots).
    qkv_t = qkv.T.astype(wqkv_ref.dtype)                                   # (3D, B*S)

    bias = bias_ref[...]                                                   # (1, D) f32
    wo2 = wo2_ref[...]                                                     # (D, D)

    for b in range(B):                 # small static batch-block loop
        c0, c1 = b * S, (b + 1) * S

        # energy[a, c] = sum_{s,d} q[s, a*hd + d] * k[s, c*hd + d]
        # (the 1/sqrt(dim) scale is already folded into the Q weights).
        energy = jnp.zeros((H, H), jnp.float32)
        for d in range(hd):
            q_d = qkv_t[d * H:(d + 1) * H, c0:c1]                          # (H, S)
            k_d = qkv_t[D + d * H:D + (d + 1) * H, c0:c1]                  # (H, S)
            energy = energy + lax.dot_general(
                q_d, k_d, (((1,), (1,)), ((), ())),
                preferred_element_type=jnp.float32)

        # Head-axis softmax, kept in f32; the divide goes to the EUP slot.
        m = jnp.max(energy, axis=-1, keepdims=True)
        e = jnp.exp(energy - m)
        attn = (e * pl.reciprocal(jnp.sum(e, axis=-1, keepdims=True),
                                  approx=True)).astype(qkv_t.dtype)

        # out4[a, s, d] = sum_c attn[a, c] * v[s, c*hd + d]; torch's raw
        # `.reshape(N, S, D)` + fc_out is folded into per-d matmuls against the
        # row-permuted fc_out weight wo2.
        y = jnp.zeros((S, D), jnp.float32)
        for d in range(hd):
            v_d = qkv_t[2 * D + d * H:2 * D + (d + 1) * H, c0:c1]          # (H, S)
            o_d = jnp.dot(attn, v_d, preferred_element_type=jnp.float32)   # (H, S)
            # Row-major regroup (H, S) -> (S, H); exact identity when seq == heads.
            z_d = o_d.reshape(S, H)
            y = y + jnp.dot(z_d.astype(wo2.dtype), wo2[d * H:(d + 1) * H, :],
                            preferred_element_type=jnp.float32)

        o_ref[b] = (y + bias).astype(o_ref.dtype)


def _choose_batch_block(n, s):
    """Largest useful batch block: keep >= 2 grid steps when possible (megacore /
    both v7x TensorCores) and stop growing once B*S >= 256 (MXU M fill)."""
    limit = n // 2 if n >= 2 else 1
    best = 1
    for cand in range(1, max(limit, 1) + 1):
        if n % cand == 0:
            best = cand
            if cand * s >= 256:
                break
    return best


def self_attention_pallas(x, wq, wk, wv, wo, bo, *, heads, batch_block=None,
                          compute_dtype=None):
    """x: (N, S, D); wq/wk/wv/wo: (D, D) in torch (out, in) convention; bo: (D,)."""
    N, S, D = x.shape
    H = heads
    hd = D // H
    assert hd * H == D, "Embedding dimension must be divisible by heads"

    if batch_block is None:
        batch_block = _choose_batch_block(N, S)
    B = batch_block
    assert N % B == 0, "batch_block must divide the batch size"

    cdt = x.dtype if compute_dtype is None else compute_dtype

    # ---- Weight preparation (plain JAX, outside the kernel; free) ----
    # Column permutation: new column d*H + h  <-  old column h*hd + d, so the
    # columns of intra-head index d (across all heads) are contiguous.
    perm = jnp.arange(D).reshape(H, hd).T.reshape(D)
    wq_t = (wq.T * (float(D) ** -0.5))[:, perm]        # fold 1/sqrt(dim) into Q
    wk_t = wk.T[:, perm]
    wv_t = wv.T[:, perm]
    wqkv = jnp.concatenate([wq_t, wk_t, wv_t], axis=1).astype(cdt)       # (D, 3D)
    # Row-permuted fc_out weight: wo2[d*H + r', :] = Wout^T[r'*hd + d, :].
    wo2 = wo.T[perm, :].astype(cdt)                                      # (D, D)
    bias = bo.reshape(1, D).astype(jnp.float32)

    kernel = functools.partial(_self_attention_kernel,
                               heads=H, head_dim=hd, seq=S, dim=D, batch_block=B)

    # VMEM budget from actual block sizes (double-buffered x/out blocks + weights
    # + f32 temporaries), clamped to the v7x-safe 64 MiB.
    block_bytes = (4 * B * S * D + 3 * D * D + D * D + D) * 4
    vmem_limit = int(min(64 << 20, max(32 << 20, 4 * block_bytes)))

    return pl.pallas_call(
        kernel,
        out_shape=jax.ShapeDtypeStruct((N, S, D), x.dtype),
        grid_spec=pltpu.PrefetchScalarGridSpec(
            num_scalar_prefetch=0,
            grid=(N // B,),
            in_specs=[
                pl.BlockSpec((B, S, D), lambda n: (n, 0, 0)),     # x batch block
                pl.BlockSpec((D, 3 * D), lambda n: (0, 0)),       # fused Wqkv (constant)
                pl.BlockSpec((D, D), lambda n: (0, 0)),           # row-permuted Wout
                pl.BlockSpec((1, D), lambda n: (0, 0)),           # fc_out bias
            ],
            out_specs=pl.BlockSpec((B, S, D), lambda n: (n, 0, 0)),
        ),
        compiler_params=pltpu.CompilerParams(
            dimension_semantics=("parallel",),
            vmem_limit_bytes=vmem_limit,
        ),
    )(x.astype(cdt), wqkv, wo2, bias)


def reference(x, wq, wk, wv, wo, bo, heads):
    """Pure-JAX transcription of the PyTorch forward (including its einsum labeling)."""
    N, S, D = x.shape
    hd = D // heads
    q = (x @ wq.T).reshape(N, S, heads, hd).transpose(0, 2, 1, 3)
    k = (x @ wk.T).reshape(N, S, heads, hd).transpose(0, 2, 1, 3)
    v = (x @ wv.T).reshape(N, S, heads, hd).transpose(0, 2, 1, 3)
    energy = jnp.einsum('nqhd,nkhd->nqk', q, k)
    attn = jax.nn.softmax(energy / (float(D) ** 0.5), axis=2)
    out = jnp.einsum('nqk,nkhd->nqhd', attn, v).reshape(N, S, heads * hd)
    return out @ wo.T + bo


if __name__ == "__main__":
    N, S, D, H = 2, 8, 32, 8   # batch, seq, dim, heads  (head_dim = 4)

    key = jax.random.PRNGKey(0)
    ks = jax.random.split(key, 6)
    scale = 1.0 / (D ** 0.5)
    x = jax.random.normal(ks[0], (N, S, D), jnp.float32)
    wq = jax.random.normal(ks[1], (D, D), jnp.float32) * scale   # torch (out, in)
    wk = jax.random.normal(ks[2], (D, D), jnp.float32) * scale
    wv = jax.random.normal(ks[3], (D, D), jnp.float32) * scale
    wo = jax.random.normal(ks[4], (D, D), jnp.float32) * scale
    bo = jax.random.normal(ks[5], (D,), jnp.float32) * 0.1

    out = self_attention_pallas(x, wq, wk, wv, wo, bo, heads=H)
    out = jax.block_until_ready(out)
    assert out.shape == (N, S, D)

    with jax.default_matmul_precision("float32"):
        ref = jax.block_until_ready(reference(x, wq, wk, wv, wo, bo, H))

    if not jnp.allclose(out, ref, atol=2e-2, rtol=2e-2):
        max_err = float(jnp.max(jnp.abs(out - ref)))
        raise AssertionError(f"Pallas output mismatch vs reference, max abs err = {max_err}")

    print("KERNEL_OK")
</pallas_src>

<mosaic_0001>
module attributes {stable_mosaic.version = 11 : i64} {
  func.func @_self_attention_kernel(%arg0: i32, %arg1: memref<1x8x32xf32, #tpu.memory_space<vmem>>, %arg2: memref<32x96xf32, #tpu.memory_space<vmem>>, %arg3: memref<32x32xf32, #tpu.memory_space<vmem>>, %arg4: memref<1x32xf32, #tpu.memory_space<vmem>>, %arg5: memref<1x8x32xf32, #tpu.memory_space<vmem>>) attributes {dimension_semantics = [#tpu.dimension_semantics<parallel>], iteration_bounds = array<i64: 2>, scalar_prefetch = 0 : i64, scratch_operands = 0 : i64, tpu.core_type = #tpu.core_type<tc>, window_params = [{transform_indices = @transform_0, window_bounds = array<i64: 1, 8, 32>}, {pipeline_mode = #tpu.pipeline_mode<synchronous>, transform_indices = @transform_1, window_bounds = array<i64: 32, 96>}, {pipeline_mode = #tpu.pipeline_mode<synchronous>, transform_indices = @transform_2, window_bounds = array<i64: 32, 32>}, {pipeline_mode = #tpu.pipeline_mode<synchronous>, transform_indices = @transform_3, window_bounds = array<i64: 1, 32>}, {transform_indices = @transform_4, window_bounds = array<i64: 1, 8, 32>}]} {
    %c0 = arith.constant 0 : index
    %c0_0 = arith.constant 0 : index
    %c0_1 = arith.constant 0 : index
    %0 = vector.load %arg1[%c0, %c0_0, %c0_1] : memref<1x8x32xf32, #tpu.memory_space<vmem>>, vector<1x8x32xf32>
    %1 = vector.shape_cast %0 : vector<1x8x32xf32> to vector<8x32xf32>
    %c0_2 = arith.constant 0 : index
    %c0_3 = arith.constant 0 : index
    %2 = vector.load %arg2[%c0_2, %c0_3] : memref<32x96xf32, #tpu.memory_space<vmem>>, vector<32x96xf32>
    %cst = arith.constant dense<0.000000e+00> : vector<8x96xf32>
    %3 = tpu.matmul %1, %2, %cst {dimension_numbers = #tpu.dot_dimension_numbers<[1], [0], [0], [1], [0, 0, 1, 1], [], []>} : vector<8x32xf32>, vector<32x96xf32>, vector<8x96xf32> -> vector<8x96xf32>
    %4 = tpu.transpose %3, [1, 0] : vector<8x96xf32> -> vector<96x8xf32>
    %c0_4 = arith.constant 0 : index
    %c0_5 = arith.constant 0 : index
    %5 = vector.load %arg4[%c0_4, %c0_5] : memref<1x32xf32, #tpu.memory_space<vmem>>, vector<1x32xf32>
    %c0_6 = arith.constant 0 : index
    %c0_7 = arith.constant 0 : index
    %6 = vector.load %arg3[%c0_6, %c0_7] : memref<32x32xf32, #tpu.memory_space<vmem>>, vector<32x32xf32>
    %cst_8 = arith.constant 0.000000e+00 : f32
    %7 = vector.broadcast %cst_8 : f32 to vector<8x8xf32>
    %8 = vector.extract_strided_slice %4 {offsets = [0, 0], sizes = [8, 8], strides = [1, 1]} : vector<96x8xf32> to vector<8x8xf32>
    %9 = vector.extract_strided_slice %4 {offsets = [32, 0], sizes = [8, 8], strides = [1, 1]} : vector<96x8xf32> to vector<8x8xf32>
    %cst_9 = arith.constant dense<0.000000e+00> : vector<8x8xf32>
    %10 = tpu.matmul %8, %9, %cst_9 {dimension_numbers = #tpu.dot_dimension_numbers<[1], [1], [0], [0], [0, 0, 1, 0], [], []>} : vector<8x8xf32>, vector<8x8xf32>, vector<8x8xf32> -> vector<8x8xf32>
    %11 = arith.addf %7, %10 : vector<8x8xf32>
    %12 = vector.extract_strided_slice %4 {offsets = [8, 0], sizes = [8, 8], strides = [1, 1]} : vector<96x8xf32> to vector<8x8xf32>
    %13 = vector.extract_strided_slice %4 {offsets = [40, 0], sizes = [8, 8], strides = [1, 1]} : vector<96x8xf32> to vector<8x8xf32>
    %cst_10 = arith.constant dense<0.000000e+00> : vector<8x8xf32>
    %14 = tpu.matmul %12, %13, %cst_10 {dimension_numbers = #tpu.dot_dimension_numbers<[1], [1], [0], [0], [0, 0, 1, 0], [], []>} : vector<8x8xf32>, vector<8x8xf32>, vector<8x8xf32> -> vector<8x8xf32>
    %15 = arith.addf %11, %14 : vector<8x8xf32>
    %16 = vector.extract_strided_slice %4 {offsets = [16, 0], sizes = [8, 8], strides = [1, 1]} : vector<96x8xf32> to vector<8x8xf32>
    %17 = vector.extract_strided_slice %4 {offsets = [48, 0], sizes = [8, 8], strides = [1, 1]} : vector<96x8xf32> to vector<8x8xf32>
    %cst_11 = arith.constant dense<0.000000e+00> : vector<8x8xf32>
    %18 = tpu.matmul %16, %17, %cst_11 {dimension_numbers = #tpu.dot_dimension_numbers<[1], [1], [0], [0], [0, 0, 1, 0], [], []>} : vector<8x8xf32>, vector<8x8xf32>, vector<8x8xf32> -> vector<8x8xf32>
    %19 = arith.addf %15, %18 : vector<8x8xf32>
    %20 = vector.extract_strided_slice %4 {offsets = [24, 0], sizes = [8, 8], strides = [1, 1]} : vector<96x8xf32> to vector<8x8xf32>
    %21 = vector.extract_strided_slice %4 {offsets = [56, 0], sizes = [8, 8], strides = [1, 1]} : vector<96x8xf32> to vector<8x8xf32>
    %cst_12 = arith.constant dense<0.000000e+00> : vector<8x8xf32>
    %22 = tpu.matmul %20, %21, %cst_12 {dimension_numbers = #tpu.dot_dimension_numbers<[1], [1], [0], [0], [0, 0, 1, 0], [], []>} : vector<8x8xf32>, vector<8x8xf32>, vector<8x8xf32> -> vector<8x8xf32>
    %23 = arith.addf %19, %22 : vector<8x8xf32>
    %cst_13 = arith.constant dense<0xFF800000> : vector<8xf32>
    %24 = vector.multi_reduction <maximumf>, %23, %cst_13 [1] : vector<8x8xf32> to vector<8xf32>
    %25 = vector.shape_cast %24 : vector<8xf32> to vector<8x1xf32>
    %26 = vector.broadcast %25 : vector<8x1xf32> to vector<8x8xf32>
    %27 = arith.subf %23, %26 : vector<8x8xf32>
    %28 = math.exp %27 : vector<8x8xf32>
    %cst_14 = arith.constant dense<0.000000e+00> : vector<8xf32>
    %29 = vector.multi_reduction <add>, %28, %cst_14 [1] : vector<8x8xf32> to vector<8xf32>
    %30 = vector.shape_cast %29 : vector<8xf32> to vector<8x1xf32>
    %31 = tpu.reciprocal %30 {approx = true} : vector<8x1xf32> -> vector<8x1xf32>
    %32 = vector.broadcast %31 : vector<8x1xf32> to vector<8x8xf32>
    %33 = arith.mulf %28, %32 : vector<8x8xf32>
    %cst_15 = arith.constant 0.000000e+00 : f32
    %34 = vector.broadcast %cst_15 : f32 to vector<8x32xf32>
    %35 = vector.extract_strided_slice %4 {offsets = [64, 0], sizes = [8, 8], strides = [1, 1]} : vector<96x8xf32> to vector<8x8xf32>
    %cst_16 = arith.constant dense<0.000000e+00> : vector<8x8xf32>
    %36 = tpu.matmul %33, %35, %cst_16 {dimension_numbers = #tpu.dot_dimension_numbers<[1], [0], [0], [1], [0, 0, 1, 1], [], []>} : vector<8x8xf32>, vector<8x8xf32>, vector<8x8xf32> -> vector<8x8xf32>
    %37 = vector.extract_strided_slice %6 {offsets = [0, 0], sizes = [8, 32], strides = [1, 1]} : vector<32x32xf32> to vector<8x32xf32>
    %cst_17 = arith.constant dense<0.000000e+00> : vector<8x32xf32>
    %38 = tpu.matmul %36, %37, %cst_17 {dimension_numbers = #tpu.dot_dimension_numbers<[1], [0], [0], [1], [0, 0, 1, 1], [], []>} : vector<8x8xf32>, vector<8x32xf32>, vector<8x32xf32> -> vector<8x32xf32>
    %39 = arith.addf %34, %38 : vector<8x32xf32>
    %40 = vector.extract_strided_slice %4 {offsets = [72, 0], sizes = [8, 8], strides = [1, 1]} : vector<96x8xf32> to vector<8x8xf32>
    %cst_18 = arith.constant dense<0.000000e+00> : vector<8x8xf32>
    %41 = tpu.matmul %33, %40, %cst_18 {dimension_numbers = #tpu.dot_dimension_numbers<[1], [0], [0], [1], [0, 0, 1, 1], [], []>} : vector<8x8xf32>, vector<8x8xf32>, vector<8x8xf32> -> vector<8x8xf32>
    %42 = vector.extract_strided_slice %6 {offsets = [8, 0], sizes = [8, 32], strides = [1, 1]} : vector<32x32xf32> to vector<8x32xf32>
    %cst_19 = arith.constant dense<0.000000e+00> : vector<8x32xf32>
    %43 = tpu.matmul %41, %42, %cst_19 {dimension_numbers = #tpu.dot_dimension_numbers<[1], [0], [0], [1], [0, 0, 1, 1], [], []>} : vector<8x8xf32>, vector<8x32xf32>, vector<8x32xf32> -> vector<8x32xf32>
    %44 = arith.addf %39, %43 : vector<8x32xf32>
    %45 = vector.extract_strided_slice %4 {offsets = [80, 0], sizes = [8, 8], strides = [1, 1]} : vector<96x8xf32> to vector<8x8xf32>
    %cst_20 = arith.constant dense<0.000000e+00> : vector<8x8xf32>
    %46 = tpu.matmul %33, %45, %cst_20 {dimension_numbers = #tpu.dot_dimension_numbers<[1], [0], [0], [1], [0, 0, 1, 1], [], []>} : vector<8x8xf32>, vector<8x8xf32>, vector<8x8xf32> -> vector<8x8xf32>
    %47 = vector.extract_strided_slice %6 {offsets = [16, 0], sizes = [8, 32], strides = [1, 1]} : vector<32x32xf32> to vector<8x32xf32>
    %cst_21 = arith.constant dense<0.000000e+00> : vector<8x32xf32>
    %48 = tpu.matmul %46, %47, %cst_21 {dimension_numbers = #tpu.dot_dimension_numbers<[1], [0], [0], [1], [0, 0, 1, 1], [], []>} : vector<8x8xf32>, vector<8x32xf32>, vector<8x32xf32> -> vector<8x32xf32>
    %49 = arith.addf %44, %48 : vector<8x32xf32>
    %50 = vector.extract_strided_slice %4 {offsets = [88, 0], sizes = [8, 8], strides = [1, 1]} : vector<96x8xf32> to vector<8x8xf32>
    %cst_22 = arith.constant dense<0.000000e+00> : vector<8x8xf32>
    %51 = tpu.matmul %33, %50, %cst_22 {dimension_numbers = #tpu.dot_dimension_numbers<[1], [0], [0], [1], [0, 0, 1, 1], [], []>} : vector<8x8xf32>, vector<8x8xf32>, vector<8x8xf32> -> vector<8x8xf32>
    %52 = vector.extract_strided_slice %6 {offsets = [24, 0], sizes = [8, 32], strides = [1, 1]} : vector<32x32xf32> to vector<8x32xf32>
    %cst_23 = arith.constant dense<0.000000e+00> : vector<8x32xf32>
    %53 = tpu.matmul %51, %52, %cst_23 {dimension_numbers = #tpu.dot_dimension_numbers<[1], [0], [0], [1], [0, 0, 1, 1], [], []>} : vector<8x8xf32>, vector<8x32xf32>, vector<8x32xf32> -> vector<8x32xf32>
    %54 = arith.addf %49, %53 : vector<8x32xf32>
    %55 = vector.broadcast %5 : vector<1x32xf32> to vector<8x32xf32>
    %56 = arith.addf %54, %55 : vector<8x32xf32>
    %c0_24 = arith.constant 0 : index
    %c0_25 = arith.constant 0 : index
    %c0_26 = arith.constant 0 : index
    %57 = vector.load %arg5[%c0_24, %c0_25, %c0_26] : memref<1x8x32xf32, #tpu.memory_space<vmem>>, vector<1x8x32xf32>
    %58 = vector.shape_cast %57 : vector<1x8x32xf32> to vector<8x32xf32>
    %59 = vector.shape_cast %56 : vector<8x32xf32> to vector<1x8x32xf32>
    tpu.vector_store %arg5[%c0_24, %c0_25, %c0_26], %59 {strides = array<i32>} : memref<1x8x32xf32, #tpu.memory_space<vmem>>, vector<1x8x32xf32>,
    return
  }
  func.func @transform_0(%arg0: i32) -> (i32, i32, i32) {
    %c0_i32 = arith.constant 0 : i32
    %c0_i32_0 = arith.constant 0 : i32
    %c0_i32_1 = arith.constant 0 : i32
    return %arg0, %c0_i32, %c0_i32_0 : i32, i32, i32
  }
  func.func @transform_1(%arg0: i32) -> (i32, i32) {
    %c0_i32 = arith.constant 0 : i32
    %c0_i32_0 = arith.constant 0 : i32
    %c0_i32_1 = arith.constant 0 : i32
    return %c0_i32, %c0_i32_0 : i32, i32
  }
  func.func @transform_2(%arg0: i32) -> (i32, i32) {
    %c0_i32 = arith.constant 0 : i32
    %c0_i32_0 = arith.constant 0 : i32
    %c0_i32_1 = arith.constant 0 : i32
    return %c0_i32, %c0_i32_0 : i32, i32
  }
  func.func @transform_3(%arg0: i32) -> (i32, i32) {
    %c0_i32 = arith.constant 0 : i32
    %c0_i32_0 = arith.constant 0 : i32
    %c0_i32_1 = arith.constant 0 : i32
    return %c0_i32, %c0_i32_0 : i32, i32
  }
  func.func @transform_4(%arg0: i32) -> (i32, i32, i32) {
    %c0_i32 = arith.constant 0 : i32
    %c0_i32_0 = arith.constant 0 : i32
    %c0_i32_1 = arith.constant 0 : i32
    return %arg0, %c0_i32, %c0_i32_0 : i32, i32, i32
  }
}

</mosaic_0001>

<bundles_post_ra>
// kernel: tpu_custom_call.1
= control target key start
LH: loop header
LB: loop body
LE: loop exit
PB: predicated region body
PF: predicated region fallthrough
CT: control target
= control target key end

     0   :  { %9 = vsyncpa [#allocation3], 0  ;;  %s2072_s0 = inlined_call_operand.hbm [shape: f32[2,8,32], index: 0, kind: input, shape index: {}]   ;;  %s2073_s1 = inlined_call_operand.hbm [shape: f32[32,96], index: 1, kind: input, shape index: {}]   ;;  %s2074_s2 = inlined_call_operand.hbm [shape: f32[32,32], index: 2, kind: input, shape index: {}]   ;;  %s2075_s3 = inlined_call_operand.vmem [shape: f32[1,32], index: 3, kind: input, shape index: {}]   ;;  %s2076_s4 = inlined_call_operand.hbm [shape: f32[2,8,32], index: 4, kind: output, shape index: {}]  }
   0x1   :  { %11 = vsyncpa [#allocation3 + $0x1], 0 }
   0x2   :  { %12 = vsyncpa [#allocation6], 0 }
   0x3   :  { %13 = vsyncpa [#allocation4], 0 }
   0x4   :  { %15 = vsyncpa [#allocation4 + $0x1], 0  ;;  %s1778_s15 = smov 0   ;;  %s1780_s16 = smov 0  }
   0x5   :  { %s1782_s17 = smov 0   ;;  %s1784_s18 = smov 0  }
   0x6 LB: > { %s1799_s19 = sadd.s32 4294967295, %s1742_s18   ;;  %s1364_s20 = sadd.s32 4294967294, %s1742_s18   ;;  %s1742_s18 = sphi %s1784_s18, %s2096_s18   ;;  %s1738_s17 = sphi %s1782_s17, %s2095_s17   ;;  %s1734_s16 = sphi %s1780_s16, %s2094_s16   ;;  %s1730_s15 = sphi %s1778_s15, %s2093_s15  }
   0x7   : > { %p41_p0 = scmp.ne.s32.totalorder %s1734_s16, %s1730_s15  ;;  %p2077_p1 = scmp.eq.s32.totalorder %s1799_s19, 0 }
   0x8   : > { %p134_p3 = scmp.eq.s32.totalorder %s1364_s20, 1  ;;  %p1365_p5 = scmp.ge.s32.totalorder %s1742_s18, 1 }
   0x9   : > { %p1808_p4 = por %p2077_p1, %p41_p0  ;;  %p141_p7 = scmp.lt.s32.totalorder %s1742_s18, 3 }
   0xa   : > { %p1813_p6 = por %p134_p3, %p41_p0  ;;  %s1744_s24 = smov [#allocation5]  }
   0xb   : > { %s2080_s21 = scalar_select %p1808_p4, 1, 0 }
   0xc   : > { %s2081_s22 = scalar_select %p1813_p6, 1, 0 }
   0xd   : > { %p1818_p8 = pnand %p1365_p5, %p141_p7  ;;  %s153_s25 = sshll.u32 %s1744_s24, 4  ;;  %s1822_s25 = int_to_ptr.vmem [resolvable:$true] %s153_s25 }
   0xe   : > { %s1745_s27 = smov [#allocation7]   ;;  %s1586_s5 = scalar_lea.hbm %s2073_s1, 512 }
   0xf   : > { %p1522_p9 = pneg %p1818_p8  ;;  %s166_s28 = sshll.u32 %s1745_s27, 4  ;;  %s1833_s28 = int_to_ptr.vmem [resolvable:$true] %s166_s28 }
  0x10   : > { %p1587_p12 = scmp.ne.s32.totalorder %s2073_s1, %s1586_s5  ;;  %p1593_p5 = scmp.lt.u32.totalorder %s1586_s5, %s2073_s1 }
  0x11   : > { %p1829_p11 = pnand %p1522_p9, %p2077_p1 }
  0x13   : > { %p1588_p13 = pneg %p1829_p11 }
  0x15   : > { %p1589_p0 = pnand %p1588_p13, %p1587_p12 }
  0x17   : > { %p1590_p3 = pneg %p1589_p0 }
  0x19   : > { %p1595_p7 = pnand %p1593_p5, %p1590_p3 }
  0x1b   : > { %1598 = shalt.err (!%p1595_p7)
}
  0x1c   : > { %s1599_s10 = scalar_lea.vmem %s1822_s25, 512  ;;  %p1607_p2 = scmp.lt.s32.totalorder %s1822_s25, %s1822_s25 }
  0x1d   : > { %p1600_p9 = scmp.ne.s32.totalorder %s1822_s25, %s1599_s10  ;;  %p1608_p12 = scmp.lt.s32.totalorder %s1599_s10, %s1599_s10 }
  0x1f   : > { %p1602_p10 = pnand %p1600_p9, %p1588_p13  ;;  %p1609_p0 = por %p1608_p12, %p1607_p2 }
  0x21   : > { %p1603_p1 = pneg %p1602_p10 }
  0x23   : > { %p1610_p6 = pnand %p1609_p0, %p1603_p1 }
  0x25   : > { %1613 = shalt.err (!%p1610_p6)
}
  0x26   : > { %s1746_s11 = smov 128   ;;  %s1747_s12 = smov 8  }
  0x27   : > { %1525 = dma.hbm_to_vmem [thread:$0]  (!%p1829_p11), %s2073_s1, 512, %s1822_s25, [#allocation6], %s1746_s11, %s1746_s11, %s1747_s12  }
  0x28   : > { %s1614_s27 = scalar_lea.hbm %s2074_s2, 512 }
  0x29   : > { %p1615_p2 = scmp.ne.s32.totalorder %s2074_s2, %s1614_s27  ;;  %p1621_p10 = scmp.lt.u32.totalorder %s1614_s27, %s2074_s2 }
  0x2b   : > { %p1617_p1 = pnand %p1615_p2, %p1588_p13 }
  0x2d   : > { %p1618_p6 = pneg %p1617_p1 }
  0x2f   : > { %p1623_p3 = pnand %p1621_p10, %p1618_p6 }
  0x31   : > { %1626 = shalt.err (!%p1623_p3)
}
  0x32   : > { %s1627_s25 = scalar_lea.vmem %s1833_s28, 512  ;;  %p1635_p12 = scmp.lt.s32.totalorder %s1833_s28, %s1833_s28 }
  0x33   : > { %p1628_p5 = scmp.ne.s32.totalorder %s1833_s28, %s1627_s25  ;;  %p1636_p0 = scmp.lt.s32.totalorder %s1627_s25, %s1627_s25 }
  0x35   : > { %p1630_p7 = pnand %p1628_p5, %p1588_p13  ;;  %p1637_p2 = por %p1636_p0, %p1635_p12 }
  0x37   : > { %p1631_p9 = pneg %p1630_p7 }
  0x39   : > { %p1638_p1 = pnand %p1637_p2, %p1631_p9 }
  0x3b   : > { %1641 = shalt.err (!%p1638_p1)
}
  0x3c   : > { %1528 = dma.hbm_to_vmem [thread:$0]  (!%p1829_p11), %s2074_s2, 512, %s1833_s28, [#allocation6], %s1746_s11, %s1746_s11, %s1747_s12  }
  0x3d   : > { %s1888_s9 = sadd.s32 1, %s1742_s18   ;;  %s28_s26 = sadd.s32 1, %s1738_s17 }
  0x3e   : > { %s25_s10 = ssub.s32 %s1742_s18, %s1888_s9  ;;  %p35_p13 = scmp.ne.s32.totalorder %s1738_s17, %s1734_s16 }
  0x3f   : > { %p26_p6 = scmp.eq.s32.totalorder %s25_s10, 0  ;;  %p36_p10 = scmp.eq.s32.totalorder %s1742_s18, 0 }
  0x40   : > { %p2084_p3 = scmp.eq.s32.totalorder %s1799_s19, 1  ;;  %p1539_p7 = scmp.lt.s32.totalorder %s1742_s18, 2 }
  0x41   : > { %s1904_s14 = scalar_select %p26_p6, %s1738_s17, %s28_s26  }
  0x42   : > { %p1898_p5 = por %p2084_p3, %p35_p13  ;;  %p37_p9 = por %p36_p10, %p35_p13 }
  0x43   : > { %s183_s20 = sand.u32 1, %s1738_s17   ;;  %s1370_s28 = sshll.u32 %s1742_s18, 7 }
  0x44   : > { %s2085_s13 = scalar_select %p1898_p5, 1, 0 }
  0x45   : > { %s1369_s24 = sshll.u32 %s183_s20, 3  ;;  %s1911_s27 = scalar_lea.hbm %s2072_s0, %s1370_s28 }
  0x46   : > { %s187_s29 = scalar_lea.vmem [#allocation2], %s1369_s24  ;;  %p1915_p11 = pnand %p1539_p7, %p37_p9 }
  0x47   : > { %s194_s30 = sshll.u32 %s187_s29, 4  ;;  %s184_s6 = scalar_lea.sflag [#allocation3], %s183_s20  ;;  %s1913_s30 = int_to_ptr.vmem [resolvable:$true] %s194_s30 }
  0x48   : > { %s1642_s25 = scalar_lea.hbm %s1911_s27, 128  ;;  %p1644_p0 = pneg %p1915_p11 }
  0x49   : > { %p1643_p12 = scmp.ne.s32.totalorder %s1911_s27, %s1642_s25  ;;  %s1647_s26 = scalar_lea.hbm %s2072_s0, 256 }
  0x4a   : > { %p1648_p13 = scmp.lt.u32.totalorder %s1911_s27, %s2072_s0  ;;  %p1649_p6 = scmp.lt.u32.totalorder %s1647_s26, %s1642_s25 }
  0x4b   : > { %p1645_p2 = pnand %p1644_p0, %p1643_p12  ;;  %p1651_p3 = scmp.lt.u32.totalorder %s1642_s25, %s1911_s27 }
  0x4c   : > { %p1650_p10 = por %p1649_p6, %p1648_p13 }
  0x4d   : > { %p1646_p1 = pneg %p1645_p2 }
  0x4e   : > { %p1652_p7 = por %p1651_p3, %p1650_p10 }
  0x50   : > { %p1653_p9 = pnand %p1652_p7, %p1646_p1 }
  0x52   : > { %1656 = shalt.err (!%p1653_p9)
}
  0x53   : > { %s1657_s20 = scalar_lea.vmem %s1913_s30, 128  ;;  %s1748_s28 = smov [#allocation2]  }
  0x54   : > { %p1658_p12 = scmp.ne.s32.totalorder %s1913_s30, %s1657_s20  ;;  %s1662_s11 = sshll.u32 %s1748_s28, 4  ;;  %s1663_s11 = int_to_ptr.vmem [resolvable:$false] %s1662_s11 }
  0x55   : > { %s1664_s12 = scalar_lea.vmem %s1663_s11, 256  ;;  %p1665_p4 = scmp.lt.s32.totalorder %s1913_s30, %s1663_s11 }
  0x56   : > { %p1660_p2 = pnand %p1658_p12, %p1644_p0  ;;  %p1666_p13 = scmp.lt.s32.totalorder %s1664_s12, %s1657_s20 }
  0x58   : > { %p1661_p5 = pneg %p1660_p2  ;;  %p1667_p6 = por %p1666_p13, %p1665_p4 }
  0x5a   : > { %p1668_p10 = pnand %p1667_p6, %p1661_p5 }
  0x5c   : > { %1671 = shalt.err (!%p1668_p10)
}
  0x5d   : > { %1532 = dma.hbm_to_vmem [thread:$0]  (!%p1915_p11), %s1911_s27, 128, %s1913_s30, %s184_s6  }
  0x5e   : > { %203 = sbr.rel (%p1818_p8) target bundleno = 1695 (0x69f), region = 36  ;;  %s1947_s29 = sand.u32 (!%p1818_p8), 1, %s1734_s16  }
  0x5f   : > { %s1372_s25 = sshll.u32 (!%p1818_p8), %s1947_s29, 3  ;;  %s206_s7 = scalar_lea.sflag (!%p1818_p8), [#allocation3], %s1947_s29 }
  0x60   : > { %s209_s8 = scalar_lea.vmem (!%p1818_p8), [#allocation2], %s1372_s25  ;;  %p2087_p4 = scmp.ne.s32.totalorder (!%p1818_p8), %s2080_s21, 0 }
  0x65   : > { %1717 = dma.done.wait (%p2087_p4), %s206_s7, 128  }
  0x66   : > { %1719 = vsyncadd (%p2087_p4), %s206_s7, 4294967168  ;;  %p2088_p5 = scmp.eq.s32.totalorder %s1799_s19, 0 }
  0x68   : > { %1721 = dma.done.wait (%p2088_p5), [#allocation6], 1024   ;;  %p2089_p8 = pmov %p2088_p5 }
  0x69   : > { %v1749_v0 = vmov 0.0|0.0   ;;  %vm1750_vm0 = vmmov 0   ;;  %v1751_v1 = vmov 0.0   ;;  %v243_v2 = vld [vmem:[#allocation5] sm:$0xff]  ;;  %v244_v3 = vld [vmem:[#allocation5 + $0x8] sm:$0xff]  ;;  %v245_v4 = vld [vmem:[#allocation5 + $0x10] sm:$0xff] }
  0x6a   : > { %1723 = vsyncadd (%p2089_p8), [#allocation6], 4294966272  ;;  %1498 = vmatprep.subr.bf16.mxu0 %v1749_v0  ;;  %1435 = vmatprep.mubr.msk.f32.mxu0 %vm1750_vm0, %v1751_v1  ;;  %v1499_v5 = vpack.c.bf16 %v244_v3, %v243_v2  ;;  %v246_v6 = vld [vmem:[#allocation5 + $0x18] sm:$0xff]  ;;  %vm247_vm1 = vcmask 261120   ;;  %vm358_vm2 = vcmask 64512   ;;  %v354_v34 = vld [vmem:[#allocation7] sm:$0xff] }
  0x6b   : > { %1438 = vmatprep.subr.mxu1 %v1751_v1  ;;  %1440 = vmatprep.mubr.msk.f32.mxu1 %vm1750_vm0, %v1751_v1  ;;  %v1502_v7 = vpack.c.bf16 %v246_v6, %v245_v4  ;;  %v242_v8 = vld [vmem:[%s209_s8] sm:$0xff]  ;;  %v355_v35 = vld [vmem:[#allocation7 + $0x8] sm:$0xff]  ;;  %s1395_s27 = sshll.u32 %s1799_s19, 7  ;;  %s241_s30 = scalar_lea.vmem [#allocation8], %s1372_s25 }
  0x6c   : > { %1500 = vmatpush3.bf16.msra.mxu0 %v1499_v5  ;;  %v356_v40 = vld [vmem:[#allocation7 + $0x10] sm:$0xff]  ;;  %v357_v46 = vld [vmem:[#allocation7 + $0x18] sm:$0xff]  ;;  %s1275_s5 = sshll.u32 %s241_s30, 4  ;;  %s2027_s10 = scalar_lea.hbm %s2076_s4, %s1395_s27  ;;  %s2029_s5 = int_to_ptr.vmem [resolvable:$true] %s1275_s5 }
  0x6d   : > { %1501 = vmatprep.subr.bf16.mxu0 %v1749_v0  ;;  %v1393_v54 = vld [vmem:[%s2075_s3] ss:$0 sm:$0xff]  ;;  %s1262_s24 = scalar_lea.sflag [#allocation4], %s1947_s29  ;;  %s1672_s19 = scalar_lea.vmem %s2029_s5, 128 }
  0x6e   : > { %p1673_p11 = scmp.ne.s32.totalorder %s2029_s5, %s1672_s19  ;;  %p2090_p0 = scmp.ne.s32.totalorder %s2085_s13, 0 }
  0x6f   : > { %s1752_s20 = smov [#allocation8]  }
  0x70   : > { %1503 = vmatpush3.bf16.msra.mxu0 %v1502_v7  ;;  %p1674_p1 = pnand %p1673_p11, %p2090_p0  ;;  %s1676_s28 = sshll.u32 %s1752_s20, 4  ;;  %s1677_s28 = int_to_ptr.vmem [resolvable:$false] %s1676_s28 }
  0x71   : > { %1458 = vmatprep.subr.mxu0 %v1751_v1  ;;  %s1678_s11 = scalar_lea.vmem %s1677_s28, 256  ;;  %p1679_p7 = scmp.lt.s32.totalorder %s2029_s5, %s1677_s28 }
  0x72   : > { %p1675_p3 = pneg %p1674_p1  ;;  %p1680_p9 = scmp.lt.s32.totalorder %s1678_s11, %s1672_s19 }
  0x73   : > { %1436 = vmatmul.mubr.msk.f32.vlgmr.msra.gmra.mrb[0].mxu0 %vm247_vm1, %v242_v8 }
  0x74   : > { %1460 = vmatprep.mubr.msk.f32.mxu0 %vm1750_vm0, %v1751_v1  ;;  %p1681_p12 = por %p1680_p9, %p1679_p7 }
  0x76   : > { %p1682_p2 = pnand %p1681_p12, %p1675_p3 }
 0x146   : > { %v317_v9 = vpop.f32.mrb[0].mxu0 }
 0x147   : > { %321 = vxpose.xlu0.b32.start.end [1/1] (short) (narrow) %v317_v9, 96  ;;  %v1437_v10 = vpop.f32.mrb[1].mxu0 }
 0x1c7   : > { %v337_v11 = vpop.trf.xlu0 }
 0x1cb   : > { %v338_v12 = vpop.trf.xlu0 }
 0x1cf   : > { %v339_v13 = vpop.trf.xlu0 }
 0x1d3   : > { %v340_v14 = vpop.trf.xlu0 }
 0x1d7   : > { %v341_v15 = vpop.trf.xlu0 }
 0x1db   : > { %v342_v16 = vpop.trf.xlu0 }
 0x1dc   : > { %1439 = vmatpush3.xpose.msk.msra.mxu1 %vm358_vm2, %v342_v16 }
 0x1dd   : > { %1443 = vmatprep.subr.mxu1 %v1751_v1 }
 0x1df   : > { %1441 = vmatmul.mubr.msk.f32.vlgmr.msra.gmra.mrb[0].mxu1 %vm358_vm2, %v338_v12  ;;  %v343_v17 = vpop.trf.xlu0 }
 0x1e0   : > { %1444 = vmatpush3.xpose.msk.msra.mxu1 %vm358_vm2, %v341_v15  ;;  %1445 = vmatprep.mubr.msk.f32.mxu1 %vm1750_vm0, %v1751_v1 }
 0x1e1   : > { %1448 = vmatprep.subr.mxu1 %v1751_v1 }
 0x1e3   : > { %v344_v18 = vpop.trf.xlu0 }
 0x1e7   : > { %1446 = vmatmul.mubr.msk.f32.vlgmr.msra.gmra.mrb[0].mxu1 %vm358_vm2, %v337_v11  ;;  %v345_v19 = vpop.trf.xlu0 }
 0x1e8   : > { %1449 = vmatpush3.xpose.msk.msra.mxu1 %vm358_vm2, %v343_v17  ;;  %1450 = vmatprep.mubr.msk.f32.mxu1 %vm1750_vm0, %v1751_v1 }
 0x1e9   : > { %1453 = vmatprep.subr.mxu1 %v1751_v1  ;;  %1459 = vmatpush3.msra.mxu0 %v345_v19 }
 0x1ea   : > { %1463 = vmatprep.subr.mxu0 %v1751_v1 }
 0x1eb   : > { %v346_v23 = vpop.trf.xlu0 }
 0x1ef   : > { %1451 = vmatmul.mubr.msk.f32.vlgmr.msra.gmra.mrb[0].mxu1 %vm358_vm2, %v339_v13  ;;  %v347_v24 = vpop.trf.xlu0 }
 0x1f0   : > { %1454 = vmatpush3.xpose.msk.msra.mxu1 %vm358_vm2, %v344_v18  ;;  %1455 = vmatprep.mubr.msk.f32.mxu1 %vm1750_vm0, %v1751_v1 }
 0x1f1   : > { %1473 = vmatprep.subr.mxu1 %v1751_v1 }
 0x1f3   : > { %v348_v25 = vpop.trf.xlu0 }
 0x1f7   : > { %1456 = vmatmul.mubr.msk.f32.vlgmr.msra.gmra.mrb[0].mxu1 %vm358_vm2, %v340_v14 }
 0x1f8   : > { %1475 = vmatprep.mubr.msk.f32.mxu1 %vm1750_vm0, %v1751_v1  ;;  %1474 = vmatpush3.msra.mxu1 %v354_v34 }
 0x1f9   : > { %1483 = vmatprep.subr.mxu1 %v1751_v1 }
 0x2ca   : > { %v660_v20 = vpop.f32.mrb[0].mxu1 }
 0x2cb   : > { %v1457_v21 = vpop.f32.mrb[1].mxu1  ;;  %v665_v22 = vsel %vm358_vm2, %v660_v20, -inf }
 0x2cc   : > { %666 = vmax.xlane.f32.xlu0 %v665_v22 }
 0x359   : > { %v667_v26 = vpop.xlane.xlu0 %666 }
 0x35a   : > { %v668_v27 = vsub.f32 %v660_v20, %v667_v26 }
 0x35c   : > { %v669_v28 = vmul.f32 1.442695, %v668_v27 }
 0x35e   : > { %1582 = vpow2.f32 %v669_v28 }
 0x368   : > { %v1583_v29 = vpop.eup %1582 }
 0x369   : > { %v671_v30 = vsel %vm358_vm2, %v1583_v29, 0.0 }
 0x36a   : > { %672 = vadd.xlane.f32.xlu1 %v671_v30 }
 0x3f7   : > { %v673_v31 = vpop.xlane.xlu1 %672 }
 0x3f8   : > { %1584 = vrcp.f32 %v673_v31 }
 0x402   : > { %v1585_v32 = vpop.eup %1584 }
 0x403   : > { %v675_v33 = vmul.f32 %v1585_v32, %v1583_v29 }
 0x405   : > { %1461 = vmatmul.mubr.msk.f32.vlgmr.msra.gmra.mrb[2].mxu0 %vm358_vm2, %v675_v33 }
 0x406   : > { %1464 = vmatpush3.msra.mxu0 %v346_v23  ;;  %1465 = vmatprep.mubr.msk.f32.mxu0 %vm1750_vm0, %v1751_v1 }
 0x407   : > { %1468 = vmatprep.subr.mxu0 %v1751_v1 }
 0x409   : > { %1466 = vmatmul.mubr.msk.f32.vlgmr.msra.gmra.mrb[4].mxu0 %vm358_vm2, %v675_v33 }
 0x40a   : > { %1470 = vmatprep.mubr.msk.f32.mxu0 %vm1750_vm0, %v1751_v1  ;;  %1469 = vmatpush3.msra.mxu0 %v355_v35 }
 0x40b   : > { %1478 = vmatprep.subr.mxu0 %v1751_v1 }
 0x4d8   : > { %v745_v36 = vpop.f32.mrb[2].mxu0 }
 0x4d9   : > { %v1462_v37 = vpop.f32.mrb[3].mxu0  ;;  %1476 = vmatmul.mubr.msk.f32.vlgmr.msra.gmra.mrb[2].mxu1 %vm358_vm2, %v745_v36 }
 0x4da   : > { %1485 = vmatprep.mubr.msk.f32.mxu1 %vm1750_vm0, %v1751_v1  ;;  %1484 = vmatpush3.msra.mxu1 %v356_v40 }
 0x4db   : > { %1493 = vmatprep.subr.mxu1 %v1751_v1 }
 0x4dc   : > { %v815_v38 = vpop.f32.mrb[4].mxu0 }
 0x4dd   : > { %v1467_v39 = vpop.f32.mrb[5].mxu0  ;;  %1471 = vmatmul.mubr.msk.f32.vlgmr.msra.gmra.mrb[6].mxu0 %vm358_vm2, %v815_v38 }
 0x4de   : > { %1479 = vmatpush3.msra.mxu0 %v347_v24  ;;  %1480 = vmatprep.mubr.msk.f32.mxu0 %vm1750_vm0, %v1751_v1 }
 0x4df   : > { %1488 = vmatprep.subr.mxu0 %v1751_v1 }
 0x4e1   : > { %1481 = vmatmul.mubr.msk.f32.vlgmr.msra.gmra.mrb[8].mxu0 %vm358_vm2, %v675_v33 }
 0x4e2   : > { %1489 = vmatpush3.msra.mxu0 %v348_v25  ;;  %1490 = vmatprep.mubr.msk.f32.mxu0 %vm1750_vm0, %v1751_v1 }
 0x4e5   : > { %1491 = vmatmul.mubr.msk.f32.vlgmr.msra.gmra.mrb[10].mxu0 %vm358_vm2, %v675_v33 }
 0x5ac   : > { %v961_v41 = vpop.f32.mrb[2].mxu1 }
 0x5ad   : > { %v1477_v42 = vpop.f32.mrb[3].mxu1 }
 0x5b0   : > { %v888_v43 = vpop.f32.mrb[6].mxu0 }
 0x5b1   : > { %v962_v44 = vadd.f32 %v961_v41, %v888_v43  ;;  %v1472_v45 = vpop.f32.mrb[7].mxu0 }
 0x5b4   : > { %v1031_v47 = vpop.f32.mrb[8].mxu0 }
 0x5b5   : > { %v1482_v48 = vpop.f32.mrb[9].mxu0  ;;  %1486 = vmatmul.mubr.msk.f32.vlgmr.msra.gmra.mrb[4].mxu1 %vm358_vm2, %v1031_v47 }
 0x5b6   : > { %1494 = vmatpush3.msra.mxu1 %v357_v46  ;;  %1495 = vmatprep.mubr.msk.f32.mxu1 %vm1750_vm0, %v1751_v1 }
 0x5b8   : > { %v1175_v49 = vpop.f32.mrb[10].mxu0 }
 0x5b9   : > { %v1492_v50 = vpop.f32.mrb[11].mxu0  ;;  %1496 = vmatmul.mubr.msk.f32.vlgmr.msra.gmra.mrb[6].mxu1 %vm358_vm2, %v1175_v49 }
 0x688   : > { %v1104_v51 = vpop.f32.mrb[4].mxu1 }
 0x689   : > { %v1108_v52 = vadd.f32 %v1104_v51, %v962_v44  ;;  %v1487_v53 = vpop.f32.mrb[5].mxu1 }
 0x68c   : > { %v1248_v55 = vpop.f32.mrb[6].mxu1 }
 0x68d   : > { %v1252_v56 = vadd.f32 %v1248_v55, %v1108_v52  ;;  %v1497_v57 = vpop.f32.mrb[7].mxu1 }
 0x68f   : > { %v1259_v58 = vadd.f32 %v1393_v54, %v1252_v56 }
 0x691   : > { %1260 = vst.msk [vmem:[%s241_s30] sm:$0xff] %vm247_vm1, %v1259_v58 }
 0x692   : > { %1685 = shalt.err (!%p1682_p2)
}
 0x693   : > { %s1686_s12 = scalar_lea.hbm %s2027_s10, 128  ;;  %s1690_s7 = scalar_lea.hbm %s2076_s4, 256 }
 0x694   : > { %p1687_p13 = scmp.ne.s32.totalorder %s2027_s10, %s1686_s12  ;;  %p1691_p4 = scmp.lt.u32.totalorder %s2027_s10, %s2076_s4 }
 0x695   : > { %p1692_p5 = scmp.lt.u32.totalorder %s1690_s7, %s1686_s12  ;;  %p1694_p11 = scmp.lt.u32.totalorder %s1686_s12, %s2027_s10 }
 0x696   : > { %p1688_p6 = pnand %p1687_p13, %p2090_p0 }
 0x697   : > { %p1693_p8 = por %p1692_p5, %p1691_p4 }
 0x698   : > { %p1689_p10 = pneg %p1688_p6 }
 0x699   : > { %p1695_p1 = por %p1694_p11, %p1693_p8 }
 0x69b   : > { %p1696_p3 = pnand %p1695_p1, %p1689_p10 }
 0x69d   : > { %1699 = shalt.err (!%p1696_p3)
}
 0x69e   : > { %1520 = dma.vmem_to_hbm [thread:$0]  (%p2090_p0), %s2029_s5, 128, %s2027_s10, %s1262_s24  }
 0x69f PF: > { %s1287_s23 = sand.u32 1, %s1730_s15   ;;  %p2091_p7 = scmp.ne.s32.totalorder %s2081_s22, 0 }
 0x6a0   : > { %p2092_p9 = scmp.ge.s32.totalorder %s1742_s18, 2  ;;  %s1288_s27 = scalar_lea.sflag [#allocation4], %s1287_s23 }
 0x6a2   : > { %p1534_p12 = pnand %p2092_p9, %p2091_p7 }
 0x6a4   : > { %1725 = dma.done.wait (!%p1534_p12), %s1288_s27, 128  }
 0x6a5   : > { %1727 = vsyncadd (!%p1534_p12), %s1288_s27, 4294967168  ;;  %p18_p2 = scmp.ge.s32.totalorder %s1888_s9, 4   ;;  %s2093_s15 = smov %s1734_s16 }
 0x6a6   : > { %s2094_s16 = smov %s1738_s17  ;;  %s2095_s17 = smov %s1904_s14 }
 0x6a7   : > { %s2096_s18 = smov %s1888_s9  ;;  %20 = sbr.rel (!%p18_p2) target bundleno = 6 (0x6), region = 89 }
 0x6ae   :  { %1293 = vsyncpa [#allocation3], 1 }
 0x6af   :  { %1295 = vsyncpa [#allocation3 + $0x1], 1 }
 0x6b0   :  { %1296 = vsyncpa [#allocation6], 1 }
 0x6b1   :  { %1297 = vsyncpa [#allocation4], 1 }
 0x6b2   :  { %1299 = vsyncpa [#allocation4 + $0x1], 1 }

</bundles_post_ra>
